<compile_context>
chip_gen: v5e
topology: v5e:2x2
jax: 0.10.0
libtpu: 0.0.40
codegen_flags: <defaults>
</compile_context>

<pallas_src>
import jax
import jax.numpy as jnp
from jax.experimental import pallas as pl
from jax.experimental.pallas import tpu as pltpu


def penalty_nn_kernel(x_ref, w1_ref, b12_ref, w2_ref, w3_ref, b3s_ref, o_ref):
    """Fused 3-layer MLP + tanh + u_bar scaling, feature-major layout.

    x_ref:   (n, TB)        batch on the lane axis (TB = batch tile)
    w1_ref:  (h, n)         w2_ref: (h, h)       w3_ref: (out, h)
    b12_ref: (h, 2)  f32    column 0 = b1, column 1 = b2
    b3s_ref: (out, 2) f32   column 0 = b3, column 1 = u_bar scale (tiled tau x)
    o_ref:   (out, TB)      output tile (dtype = out_dtype)
    """
    x = x_ref[...]
    b1 = b12_ref[:, 0:1]
    b2 = b12_ref[:, 1:2]
    b3 = b3s_ref[:, 0:1]
    scale = b3s_ref[:, 1:2]

    # Layer 1: (h, n) @ (n, TB) -> (h, TB), f32 accumulate, f32 bias + ReLU.
    h1 = jnp.dot(w1_ref[...], x, preferred_element_type=jnp.float32) + b1
    h1 = jnp.maximum(h1, 0.0)                      # stays f32 (never hits HBM)
    # Layer 2: (h, h) @ (h, TB) -> (h, TB).
    h2 = jnp.dot(w2_ref[...], h1, preferred_element_type=jnp.float32) + b2
    h2 = jnp.maximum(h2, 0.0)
    # Layer 3 + tanh (EUP slot) + per-row u_bar scale (VPU slot).
    v = jnp.tanh(jnp.dot(w3_ref[...], h2, preferred_element_type=jnp.float32) + b3)
    o_ref[...] = (v * scale).astype(o_ref.dtype)


def penalty_nn_forward(X0, params, u_bar, tau, *,
                       tile_b=2048, compute_dtype=None, out_dtype=None):
    """X0: (n, batch).  Returns U: (m*tau, batch).

    compute_dtype defaults to X0.dtype (no wrapper-side cast pass); pass bf16
    X0 from upstream to use bf16 matmul operands.  out_dtype defaults to
    X0.dtype so the dominant output writeback shrinks with the input dtype.
    """
    w1, b1, w2, b2, w3, b3 = params               # w1:(n,h) w2:(h,h) w3:(h,out)
    n, batch = X0.shape
    m = u_bar.shape[0]
    out_dim = m * tau
    hidden = w1.shape[1]
    assert w3.shape[1] == out_dim

    cdt = X0.dtype if compute_dtype is None else compute_dtype
    odt = X0.dtype if out_dtype is None else out_dtype

    # One-time tiny-weight transposes so the kernel computes Wt @ x and the
    # large activations keep the module's native (feature, batch) layout.
    w1t = jnp.asarray(w1).T.astype(cdt)                         # (h, n)
    w2t = jnp.asarray(w2).T.astype(cdt)                         # (h, h)
    w3t = jnp.asarray(w3).T.astype(cdt)                         # (out, h)
    # Pack biases + u_bar scale into two small f32 slabs (fewer pipeline arms).
    b12 = jnp.stack([jnp.asarray(b1), jnp.asarray(b2)], axis=1).astype(jnp.float32)  # (h, 2)
    scale = jnp.tile(jnp.asarray(u_bar).reshape(m, 1), (tau, 1))                     # (out, 1)
    b3s = jnp.concatenate(
        [jnp.asarray(b3).reshape(out_dim, 1), scale], axis=1).astype(jnp.float32)    # (out, 2)

    # Input in its incoming dtype unless an explicit compute_dtype overrides it
    # (an explicit override costs a separate XLA cast pass over X0).
    x = X0 if X0.dtype == cdt else X0.astype(cdt)

    LANE = 128
    if batch < LANE:
        # Round a tiny batch up to one full lane-width tile: lane-dense vst
        # instead of masked vst.msk partial stores.
        x = jnp.pad(x, ((0, 0), (0, LANE - batch)))
        b_eff = LANE
    else:
        b_eff = batch

    # Batch tile: multiple of 128, <= tile_b, and capped so the grid has >= 2
    # steps whenever batch allows (both v7x TensorCores get work).
    tb = max(LANE, (min(tile_b, b_eff) // LANE) * LANE)
    if b_eff >= 2 * LANE:
        tb = min(tb, max(LANE, ((b_eff // 2) // LANE) * LANE))
    grid = (pl.cdiv(b_eff, tb),)    # ragged last block masked by Pallas; no pad pass

    def const(shape):
        # Weights / biases / scale: constant block index -> VMEM-resident.
        return pl.BlockSpec(shape, lambda i: (0, 0))

    out = pl.pallas_call(
        penalty_nn_kernel,
        out_shape=jax.ShapeDtypeStruct((out_dim, b_eff), odt),
        grid=grid,
        in_specs=[
            pl.BlockSpec((n, tb), lambda i: (0, i)),          # x tile, pipelined
            const((hidden, n)),
            const((hidden, 2)),
            const((hidden, hidden)),
            const((out_dim, hidden)),
            const((out_dim, 2)),
        ],
        out_specs=pl.BlockSpec((out_dim, tb), lambda i: (0, i)),
        compiler_params=pltpu.CompilerParams(
            dimension_semantics=("parallel",),    # v7x: shard batch across 2 TCs
        ),
    )(x, w1t, b12, w2t, w3t, b3s)

    return out[:, :batch]                                      # (m*tau, batch)


def init_params(key, n, hidden, out_dim):
    ks = jax.random.split(key, 6)
    w1 = jax.random.normal(ks[0], (n, hidden), jnp.float32) * (1.0 / jnp.sqrt(n))
    b1 = jax.random.normal(ks[1], (hidden,), jnp.float32) * 0.01
    w2 = jax.random.normal(ks[2], (hidden, hidden), jnp.float32) * (1.0 / jnp.sqrt(hidden))
    b2 = jax.random.normal(ks[3], (hidden,), jnp.float32) * 0.01
    w3 = jax.random.normal(ks[4], (hidden, out_dim), jnp.float32) * (1.0 / jnp.sqrt(hidden))
    b3 = jax.random.normal(ks[5], (out_dim,), jnp.float32) * 0.01
    return (w1, b1, w2, b2, w3, b3)


if __name__ == "__main__":
    # Small synthetic system: state dim n=4, input dim m=2, horizon tau=4.
    # batch=256 -> tb=128, grid=(2,): exercises the pipelined grid and gives
    # v7x's two TensorCores one step each.
    n, m, tau = 4, 2, 4
    hidden = 32
    batch = 256
    out_dim = m * tau

    key = jax.random.PRNGKey(0)
    k_x, k_p, k_u = jax.random.split(key, 3)

    X0 = jax.random.normal(k_x, (n, batch), jnp.float32)               # (n, batch)
    params = init_params(k_p, n, hidden, out_dim)
    u_bar = jnp.abs(jax.random.normal(k_u, (m, 1), jnp.float32)) + 0.5  # (m, 1)

    # f32 path (strict correctness check).
    U = jax.block_until_ready(penalty_nn_forward(X0, params, u_bar, tau))

    # Pure-JAX reference (same math as the PyTorch forward).
    w1, b1, w2, b2, w3, b3 = params
    h1 = jnp.maximum(X0.T @ w1 + b1, 0.0)
    h2 = jnp.maximum(h1 @ w2 + b2, 0.0)
    V = jnp.tanh(h2 @ w3 + b3).T                                        # (m*tau, batch)
    U_ref = V * jnp.tile(u_bar, (tau, batch))
    assert U.shape == (out_dim, batch)
    assert jnp.allclose(U, U_ref, atol=1e-5, rtol=1e-5)

    # bf16 path: X0 arrives already bf16 from upstream (no wrapper cast pass);
    # only x / w1 are bf16 matmul operands, f32 accumulate + f32 intermediates,
    # bf16 output writeback -> loose tolerance covers operand/output rounding.
    X0_bf16 = X0.astype(jnp.bfloat16)
    U_bf16 = jax.block_until_ready(penalty_nn_forward(X0_bf16, params, u_bar, tau))
    assert U_bf16.shape == (out_dim, batch)
    assert jnp.allclose(U_bf16.astype(jnp.float32), U_ref, atol=1e-1, rtol=5e-2)

    print("KERNEL_OK")
</pallas_src>

<mosaic_0001>
module attributes {stable_mosaic.version = 11 : i64} {
  func.func @penalty_nn_kernel(%arg0: i32, %arg1: memref<4x128xf32, #tpu.memory_space<vmem>>, %arg2: memref<32x4xf32, #tpu.memory_space<vmem>>, %arg3: memref<32x2xf32, #tpu.memory_space<vmem>>, %arg4: memref<32x32xf32, #tpu.memory_space<vmem>>, %arg5: memref<8x32xf32, #tpu.memory_space<vmem>>, %arg6: memref<8x2xf32, #tpu.memory_space<vmem>>, %arg7: memref<8x128xf32, #tpu.memory_space<vmem>>) attributes {dimension_semantics = [#tpu.dimension_semantics<parallel>], iteration_bounds = array<i64: 2>, scalar_prefetch = 0 : i64, scratch_operands = 0 : i64, tpu.core_type = #tpu.core_type<tc>, window_params = [{transform_indices = @transform_0, window_bounds = array<i64: 4, 128>}, {pipeline_mode = #tpu.pipeline_mode<synchronous>, transform_indices = @transform_1, window_bounds = array<i64: 32, 4>}, {pipeline_mode = #tpu.pipeline_mode<synchronous>, transform_indices = @transform_2, window_bounds = array<i64: 32, 2>}, {pipeline_mode = #tpu.pipeline_mode<synchronous>, transform_indices = @transform_3, window_bounds = array<i64: 32, 32>}, {pipeline_mode = #tpu.pipeline_mode<synchronous>, transform_indices = @transform_4, window_bounds = array<i64: 8, 32>}, {pipeline_mode = #tpu.pipeline_mode<synchronous>, transform_indices = @transform_5, window_bounds = array<i64: 8, 2>}, {transform_indices = @transform_6, window_bounds = array<i64: 8, 128>}]} {
    %c0 = arith.constant 0 : index
    %c0_0 = arith.constant 0 : index
    %0 = vector.load %arg1[%c0, %c0_0] : memref<4x128xf32, #tpu.memory_space<vmem>>, vector<4x128xf32>
    %c0_1 = arith.constant 0 : index
    %c0_2 = arith.constant 0 : index
    %1 = vector.load %arg3[%c0_1, %c0_2] : memref<32x2xf32, #tpu.memory_space<vmem>>, vector<32x1xf32>
    %c0_3 = arith.constant 0 : index
    %c1 = arith.constant 1 : index
    %2 = vector.load %arg3[%c0_3, %c1] : memref<32x2xf32, #tpu.memory_space<vmem>>, vector<32x1xf32>
    %c0_4 = arith.constant 0 : index
    %c0_5 = arith.constant 0 : index
    %3 = vector.load %arg6[%c0_4, %c0_5] : memref<8x2xf32, #tpu.memory_space<vmem>>, vector<8x1xf32>
    %c0_6 = arith.constant 0 : index
    %c1_7 = arith.constant 1 : index
    %4 = vector.load %arg6[%c0_6, %c1_7] : memref<8x2xf32, #tpu.memory_space<vmem>>, vector<8x1xf32>
    %c0_8 = arith.constant 0 : index
    %c0_9 = arith.constant 0 : index
    %5 = vector.load %arg2[%c0_8, %c0_9] : memref<32x4xf32, #tpu.memory_space<vmem>>, vector<32x4xf32>
    %cst = arith.constant dense<0.000000e+00> : vector<32x128xf32>
    %6 = tpu.matmul %5, %0, %cst {dimension_numbers = #tpu.dot_dimension_numbers<[1], [0], [0], [1], [0, 0, 1, 1], [], []>} : vector<32x4xf32>, vector<4x128xf32>, vector<32x128xf32> -> vector<32x128xf32>
    %7 = vector.broadcast %1 : vector<32x1xf32> to vector<32x128xf32>
    %8 = arith.addf %6, %7 : vector<32x128xf32>
    %cst_10 = arith.constant 0.000000e+00 : f32
    %9 = vector.broadcast %cst_10 : f32 to vector<32x128xf32>
    %10 = arith.maximumf %8, %9 : vector<32x128xf32>
    %c0_11 = arith.constant 0 : index
    %c0_12 = arith.constant 0 : index
    %11 = vector.load %arg4[%c0_11, %c0_12] : memref<32x32xf32, #tpu.memory_space<vmem>>, vector<32x32xf32>
    %cst_13 = arith.constant dense<0.000000e+00> : vector<32x128xf32>
    %12 = tpu.matmul %11, %10, %cst_13 {dimension_numbers = #tpu.dot_dimension_numbers<[1], [0], [0], [1], [0, 0, 1, 1], [], []>} : vector<32x32xf32>, vector<32x128xf32>, vector<32x128xf32> -> vector<32x128xf32>
    %13 = vector.broadcast %2 : vector<32x1xf32> to vector<32x128xf32>
    %14 = arith.addf %12, %13 : vector<32x128xf32>
    %cst_14 = arith.constant 0.000000e+00 : f32
    %15 = vector.broadcast %cst_14 : f32 to vector<32x128xf32>
    %16 = arith.maximumf %14, %15 : vector<32x128xf32>
    %c0_15 = arith.constant 0 : index
    %c0_16 = arith.constant 0 : index
    %17 = vector.load %arg5[%c0_15, %c0_16] : memref<8x32xf32, #tpu.memory_space<vmem>>, vector<8x32xf32>
    %cst_17 = arith.constant dense<0.000000e+00> : vector<8x128xf32>
    %18 = tpu.matmul %17, %16, %cst_17 {dimension_numbers = #tpu.dot_dimension_numbers<[1], [0], [0], [1], [0, 0, 1, 1], [], []>} : vector<8x32xf32>, vector<32x128xf32>, vector<8x128xf32> -> vector<8x128xf32>
    %19 = vector.broadcast %3 : vector<8x1xf32> to vector<8x128xf32>
    %20 = arith.addf %18, %19 : vector<8x128xf32>
    %21 = math.tanh %20 : vector<8x128xf32>
    %22 = vector.broadcast %4 : vector<8x1xf32> to vector<8x128xf32>
    %23 = arith.mulf %21, %22 : vector<8x128xf32>
    %c0_18 = arith.constant 0 : index
    %c0_19 = arith.constant 0 : index
    %24 = vector.load %arg7[%c0_18, %c0_19] : memref<8x128xf32, #tpu.memory_space<vmem>>, vector<8x128xf32>
    tpu.vector_store %arg7[%c0_18, %c0_19], %23 {strides = array<i32>} : memref<8x128xf32, #tpu.memory_space<vmem>>, vector<8x128xf32>,
    return
  }
  func.func @transform_0(%arg0: i32) -> (i32, i32) {
    %c0_i32 = arith.constant 0 : i32
    %c0_i32_0 = arith.constant 0 : i32
    return %c0_i32, %arg0 : i32, i32
  }
  func.func @transform_1(%arg0: i32) -> (i32, i32) {
    %c0_i32 = arith.constant 0 : i32
    %c0_i32_0 = arith.constant 0 : i32
    %c0_i32_1 = arith.constant 0 : i32
    return %c0_i32, %c0_i32_0 : i32, i32
  }
  func.func @transform_2(%arg0: i32) -> (i32, i32) {
    %c0_i32 = arith.constant 0 : i32
    %c0_i32_0 = arith.constant 0 : i32
    %c0_i32_1 = arith.constant 0 : i32
    return %c0_i32, %c0_i32_0 : i32, i32
  }
  func.func @transform_3(%arg0: i32) -> (i32, i32) {
    %c0_i32 = arith.constant 0 : i32
    %c0_i32_0 = arith.constant 0 : i32
    %c0_i32_1 = arith.constant 0 : i32
    return %c0_i32, %c0_i32_0 : i32, i32
  }
  func.func @transform_4(%arg0: i32) -> (i32, i32) {
    %c0_i32 = arith.constant 0 : i32
    %c0_i32_0 = arith.constant 0 : i32
    %c0_i32_1 = arith.constant 0 : i32
    return %c0_i32, %c0_i32_0 : i32, i32
  }
  func.func @transform_5(%arg0: i32) -> (i32, i32) {
    %c0_i32 = arith.constant 0 : i32
    %c0_i32_0 = arith.constant 0 : i32
    %c0_i32_1 = arith.constant 0 : i32
    return %c0_i32, %c0_i32_0 : i32, i32
  }
  func.func @transform_6(%arg0: i32) -> (i32, i32) {
    %c0_i32 = arith.constant 0 : i32
    %c0_i32_0 = arith.constant 0 : i32
    return %c0_i32, %arg0 : i32, i32
  }
}

</mosaic_0001>

<bundles_post_ra>
// kernel: tpu_custom_call.1
= control target key start
LH: loop header
LB: loop body
LE: loop exit
PB: predicated region body
PF: predicated region fallthrough
CT: control target
= control target key end

     0   :  { %11 = vsyncpa [#allocation3], 0  ;;  %s811_s0 = inlined_call_operand.vmem [shape: f32[4,256], index: 0, kind: input, shape index: {}]   ;;  %s812_s1 = inlined_call_operand.vmem [shape: f32[32,4], index: 1, kind: input, shape index: {}]   ;;  %s813_s2 = inlined_call_operand.vmem [shape: f32[32,2], index: 2, kind: input, shape index: {}]   ;;  %s814_s3 = inlined_call_operand.vmem [shape: f32[32,32], index: 3, kind: input, shape index: {}]   ;;  %s815_s4 = inlined_call_operand.vmem [shape: f32[8,32], index: 4, kind: input, shape index: {}]   ;;  %s816_s5 = inlined_call_operand.vmem [shape: f32[8,2], index: 5, kind: input, shape index: {}]   ;;  %s817_s6 = inlined_call_operand.hbm [shape: f32[8,256], index: 6, kind: output, shape index: {}]  }
   0x1   :  { %13 = vsyncpa [#allocation3 + $0x1], 0  ;;  %s679_s21 = smov 0   ;;  %s681_s22 = smov 0  }
   0x2   :  { %s683_s23 = smov 0   ;;  %s685_s24 = smov 0  }
   0x3 LB: > { %s700_s25 = sadd.s32 4294967295, %s640_s24   ;;  %s504_s26 = sadd.s32 4294967294, %s640_s24   ;;  %s640_s24 = sphi %s685_s24, %s823_s24   ;;  %s636_s23 = sphi %s683_s23, %s822_s23   ;;  %s632_s22 = sphi %s681_s22, %s821_s22   ;;  %s628_s21 = sphi %s679_s21, %s820_s21  }
   0x4   : > { %s704_s27 = sadd.s32 1, %s640_s24   ;;  %s157_s28 = sadd.s32 1, %s636_s23 }
   0x5   : > { %s154_s29 = ssub.s32 %s640_s24, %s704_s27  ;;  %p167_p0 = scmp.ne.s32.totalorder %s636_s23, %s632_s22 }
   0x6   : > { %p155_p1 = scmp.eq.s32.totalorder %s154_s29, 0  ;;  %p168_p2 = scmp.eq.s32.totalorder %s700_s25, 1 }
   0x7   : > { %p173_p3 = scmp.ne.s32.totalorder %s632_s22, %s628_s21  ;;  %p174_p4 = scmp.eq.s32.totalorder %s504_s26, 1 }
   0x8   : > { %s715_s30 = scalar_select %p155_p1, %s636_s23, %s157_s28  }
   0x9   : > { %p717_p5 = por %p168_p2, %p167_p0  ;;  %p721_p6 = por %p174_p4, %p173_p3 }
   0xa   : > { %p507_p7 = scmp.ge.s32.totalorder %s640_s24, 1  ;;  %p214_p8 = scmp.lt.s32.totalorder %s640_s24, 3 }
   0xc   : > { %p215_p9 = pnand %p507_p7, %p214_p8 }
   0xd   : > { %p243_p10 = scmp.lt.s32.totalorder (!%p215_p9), %s700_s25, 1  ;;  %s240_s12 = sand.u32 (!%p215_p9), 1, %s632_s22  }
   0xe   : > { %218 = sbr.rel (%p215_p9) target bundleno = 473 (0x1d9), region = 44  ;;  %s430_s26 = scalar_lea.sflag (!%p215_p9), [#allocation3], %s240_s12 }
   0xf   : > { %s598_s10 = scalar_lea.hbm (!%p215_p9), %s817_s6, 16 }
  0x13   : > { %v642_v0 = vmov 0   ;;  %v249_v1 = vld [vmem:[%s813_s2 + $0x8] sm:$0xff]  ;;  %v251_v2 = vld [vmem:[%s813_s2 + $0x18] sm:$0xff]  ;;  %s244_s13 = scalar_select %p243_p10, %s700_s25, 1  ;;  %vm290_vm0 = vcmask 1043456   ;;  %v253_v3 = vld [vmem:[%s812_s1] sm:$0xff] }
  0x14   : > { %571 = vset.pattern.permute.xlu1 %v642_v0  ;;  %570 = vset.pattern.permute.xlu0 %v642_v0  ;;  %vm277_vm1 = vcmask 31744   ;;  %v256_v4 = vld [vmem:[%s812_s1 + $0x18] sm:$0xff]  ;;  %v248_v6 = vld [vmem:[%s813_s2] sm:$0xff]  ;;  %v250_v7 = vld [vmem:[%s813_s2 + $0x10] sm:$0xff]  ;;  %v643_v11 = vmov 1   ;;  %vm347_vm2 = vcmask 261120  }
  0x15   : > { %264 = vperm.xlu1 %571, %v249_v1   ;;  %274 = vperm.xlu0 %570, %v251_v2   ;;  %s509_s14 = sshll.u32 %s244_s13, 2  ;;  %v254_v8 = vld [vmem:[%s812_s1 + $0x8] sm:$0xff]  ;;  %v255_v9 = vld [vmem:[%s812_s1 + $0x10] sm:$0xff]  ;;  %v252_v18 = vld [vmem:[%s816_s5] sm:$0xff]  ;;  %s508_s13 = sshll.u32 %s240_s12, 3 }
  0x16   : > { %s246_s17 = scalar_lea.vmem %s811_s0, %s509_s14  ;;  %572 = vset.pattern.permute.xlu2 %v643_v11  ;;  %v329_v28 = vld [vmem:[%s814_s3 + $0x10] sm:$0xff]  ;;  %v327_v29 = vld [vmem:[%s814_s3] sm:$0xff]  ;;  %v330_v30 = vld [vmem:[%s814_s3 + $0x18] sm:$0xff]  ;;  %s521_s14 = sshll.u32 %s700_s25, 3 }
  0x17   : > { %v247_v5 = vld [vmem:[%s246_s17] sm:$0xf]  ;;  %344 = vperm.xlu2 %572, %v251_v2   ;;  %v328_v31 = vld [vmem:[%s814_s3 + $0x8] sm:$0xff]  ;;  %s440_s17 = scalar_lea.hbm %s817_s6, %s521_s14  ;;  %s242_s18 = scalar_lea.vmem [#allocation2], %s508_s13 }
  0x18   : > { %510 = vmatpush.msk.msra.mxu0 %vm290_vm0, %v247_v5  ;;  %524 = vmatpush.msk.msra.mxu2 %vm290_vm0, %v247_v5  ;;  %v393_v48 = vld [vmem:[%s815_s4] sm:$0xff]  ;;  %s442_s19 = sshll.u32 %s242_s18, 4  ;;  %s444_s20 = sshll.u32 %s440_s17, 4  ;;  %s443_s19 = int_to_ptr.vmem [resolvable:$true] %s442_s19  ;;  %s445_s20 = int_to_ptr.hbm [resolvable:$true] %s444_s20 }
  0x19   : > { %511 = vmatmul.msk.f32.vlgmr.msra.gmra.mxu0 %vm277_vm1, %v253_v3  ;;  %514 = vmatmul.msk.f32.vlgmr.msra.gmra.mxu2 %vm277_vm1, %v256_v4  ;;  %s592_s28 = sshra.s32 %s445_s20, 4  ;;  %s593_s28 = int_to_ptr.hbm [resolvable:$true] %s592_s28 }
  0x1a   : > { %s594_s29 = scalar_lea.hbm %s593_s28, 8  ;;  %p599_p0 = scmp.lt.s32.totalorder %s593_s28, %s817_s6 }
  0x1b   : > { %p595_p11 = scmp.ne.s32.totalorder %s593_s28, %s594_s29  ;;  %p600_p1 = scmp.lt.s32.totalorder %s598_s10, %s594_s29 }
  0x1d   : > { %259 = vperm.xlu1 %571, %v248_v6   ;;  %269 = vperm.xlu0 %570, %v250_v7   ;;  %p596_p12 = pnand %p595_p11, %p717_p5  ;;  %p601_p2 = por %p600_p1, %p599_p0 }
  0x1f   : > { %340 = vperm.xlu2 %572, %v250_v7   ;;  %p597_p13 = pneg %p596_p12 }
  0x21   : > { %512 = vmatmul.msk.f32.gmra.mxu0 %vm277_vm1, %v254_v8  ;;  %p602_p3 = pnand %p601_p2, %p597_p13 }
  0x25   : > { %574 = vset.pattern.permute.xlu1 %v643_v11  ;;  %573 = vset.pattern.permute.xlu0 %v643_v11 }
  0x26   : > { %332 = vperm.xlu1 %574, %v248_v6   ;;  %336 = vperm.xlu0 %573, %v249_v1  }
  0x27   : > { %575 = vset.pattern.permute.xlu2 %v642_v0 }
  0x28   : > { %396 = vperm.xlu2 %575, %v252_v18  }
  0x29   : > { %513 = vmatmul.msk.f32.gmra.mxu0 %vm277_vm1, %v255_v9 }
  0x2e   : > { %424 = vperm.xlu1 %574, %v252_v18  }
  0x71   : > { %v345_v32 = vpop.permute.xlu2 %344 }
  0x79   : > { %v341_v35 = vpop.permute.xlu2 %340 }
  0x82   : > { %v397_v49 = vpop.permute.xlu2 %396 }
  0x87   : > { %v265_v12 = vpop.permute.xlu1 %264  ;;  %v275_v13 = vpop.permute.xlu0 %274 }
  0x8f   : > { %v260_v19 = vpop.permute.xlu1 %259  ;;  %v270_v20 = vpop.permute.xlu0 %269 }
  0x96   : > { %v311_v10 = vpop.f32.mrf.mxu0 }
  0x97   : > { %v312_v24 = vadd.f32 %v311_v10, %v260_v19 }
  0x98   : > { %v337_v36 = vpop.permute.xlu0 %336  ;;  %v333_v42 = vpop.permute.xlu1 %332 }
  0x99   : > { %v323_v27 = vmax.f32 %v312_v24, 0.0 }
  0x9c   : > { %v320_v14 = vpop.f32.mrf.mxu2 }
  0x9d   : > { %v321_v15 = vadd.f32 %v320_v14, %v275_v13 }
  0x9e   : > { %v314_v16 = vpop.f32.mrf.mxu0 }
  0x9f   : > { %v326_v17 = vmax.f32 %v321_v15, 0.0  ;;  %v315_v22 = vadd.f32 %v314_v16, %v265_v12 }
  0xa0   : > { %v425_v53 = vpop.permute.xlu1 %424 }
  0xa1   : > { %372 = vmatpush.msra.mxu1 %v326_v17  ;;  %525 = vmatpush.msra.mxu3 %v326_v17  ;;  %v324_v26 = vmax.f32 %v315_v22, 0.0 }
  0xa6   : > { %v317_v21 = vpop.f32.mrf.mxu0 }
  0xa7   : > { %v318_v23 = vadd.f32 %v317_v21, %v270_v20 }
  0xa9   : > { %v325_v25 = vmax.f32 %v318_v23, 0.0 }
  0xab   : > { %373 = vmatpush.msra.mxu1 %v325_v25  ;;  %526 = vmatpush.msra.mxu3 %v325_v25 }
  0xad   : > { %374 = vmatpush.msra.mxu1 %v324_v26  ;;  %527 = vmatpush.msra.mxu3 %v324_v26 }
  0xaf   : > { %375 = vmatpush.msra.mxu1 %v323_v27  ;;  %528 = vmatpush.msra.mxu3 %v323_v27 }
  0xb0   : > { %517 = vmatmul.msk.f32.vlgmr.msra.gmra.mxu3 %vm347_vm2, %v329_v28  ;;  %515 = vmatmul.msk.f32.vlgmr.msra.gmra.mxu1 %vm347_vm2, %v327_v29 }
  0xb8   : > { %518 = vmatmul.msk.f32.gmra.mxu3 %vm347_vm2, %v330_v30  ;;  %516 = vmatmul.msk.f32.gmra.mxu1 %vm347_vm2, %v328_v31 }
 0x12d   : > { %v377_v33 = vpop.f32.mrf.mxu1 }
 0x12e   : > { %v378_v45 = vadd.f32 %v377_v33, %v333_v42 }
 0x130   : > { %v389_v47 = vmax.f32 %v378_v45, 0.0 }
 0x133   : > { %v383_v34 = vpop.f32.mrf.mxu3 }
 0x134   : > { %v384_v39 = vadd.f32 %v383_v34, %v341_v35 }
 0x135   : > { %v380_v37 = vpop.f32.mrf.mxu1 }
 0x136   : > { %v381_v41 = vadd.f32 %v380_v37, %v337_v36  ;;  %v391_v44 = vmax.f32 %v384_v39, 0.0 }
 0x138   : > { %v390_v46 = vmax.f32 %v381_v41, 0.0 }
 0x13b   : > { %v386_v38 = vpop.f32.mrf.mxu3 }
 0x13c   : > { %v387_v40 = vadd.f32 %v386_v38, %v345_v32 }
 0x13e   : > { %v392_v43 = vmax.f32 %v387_v40, 0.0 }
 0x140   : > { %414 = vmatpush.msrb.mxu2 %v392_v43 }
 0x142   : > { %415 = vmatpush.msrb.mxu2 %v391_v44 }
 0x144   : > { %416 = vmatpush.msrb.mxu2 %v390_v46 }
 0x146   : > { %417 = vmatpush.msrb.mxu2 %v389_v47 }
 0x147   : > { %519 = vmatmul.msk.f32.vlgmr.msrb.gmra.mxu2 %vm347_vm2, %v393_v48 }
 0x1ca   : > { %v419_v50 = vpop.f32.mrf.mxu2 }
 0x1cb   : > { %v420_v51 = vadd.f32 %v419_v50, %v397_v49 }
 0x1cd   : > { %576 = vtanh.f32 %v420_v51 }
 0x1d3   : > { %v577_v52 = vpop.eup %576 }
 0x1d4   : > { %v427_v54 = vmul.f32 %v577_v52, %v425_v53 }
 0x1d6   : > { %428 = vst [vmem:[%s242_s18] sm:$0xff] %v427_v54 }
 0x1d7   : > { %605 = shalt.err (!%p602_p3)
}
 0x1d8   : > { %529 = dma.vmem_to_hbm [thread:$0]  (%p717_p5), %s443_s19, 128, %s445_s20, %s430_s26  }
 0x1d9 PF: > { %p535_p4 = scmp.ge.s32.totalorder %s640_s24, 2  ;;  %s456_s12 = sand.u32 1, %s628_s21  }
 0x1da   : > { %s457_s14 = scalar_lea.sflag [#allocation3], %s456_s12 }
 0x1db   : > { %p532_p7 = pnand %p535_p4, %p721_p6 }
 0x1dd   : > { %p533_p8 = pneg %p532_p7 }
 0x1df   : > { %623 = dma.done.wait (%p533_p8), %s457_s14, 128  }
 0x1e0   : > { %625 = vsyncadd (%p533_p8), %s457_s14, 4294967168  ;;  %p16_p9 = scmp.ge.s32.totalorder %s704_s27, 4   ;;  %s820_s21 = smov %s632_s22 }
 0x1e1   : > { %s821_s22 = smov %s636_s23  ;;  %s822_s23 = smov %s715_s30 }
 0x1e2   : > { %s823_s24 = smov %s704_s27  ;;  %18 = sbr.rel (!%p16_p9) target bundleno = 3 (0x3), region = 79 }
 0x1e7   :  { %463 = vsyncpa [#allocation3], 1 }
 0x1e8   :  { %465 = vsyncpa [#allocation3 + $0x1], 1 }

</bundles_post_ra>
